<compile_context>
chip_gen: v7x
topology: tpu7x:2x2x1
jax: 0.10.0
libtpu: 0.0.40
codegen_flags: <defaults>
</compile_context>

<pallas_src>
import math
from functools import partial

import jax
import jax.numpy as jnp
from jax.experimental import pallas as pl
from jax.experimental.pallas import tpu as pltpu

_LANE = 128
_SUBLANE = 8
_MAX_BLOCK_BYTES = 2 * 1024 * 1024      # per-block soft budget (in+out, 2x buffered)
_VMEM_LIMIT_BYTES = 32 * 1024 * 1024    # safe on v5e/v6e (128 MiB) and v7x (64 MiB)


def _simplify(shape, order):
    """Drop size-1 axes; coalesce input axes that stay adjacent & in order."""
    keep = [a for a in range(len(shape)) if shape[a] != 1]
    remap = {a: i for i, a in enumerate(keep)}
    shape1 = [shape[a] for a in keep]
    order1 = [remap[a] for a in order if a in remap]
    if not shape1:
        return (), ()
    runs = []
    for a in order1:
        if runs and a == runs[-1][-1] + 1:
            runs[-1].append(a)
        else:
            runs.append([a])
    runs_in = sorted(runs, key=lambda r: r[0])
    new_id = {tuple(r): i for i, r in enumerate(runs_in)}
    r_shape = tuple(int(math.prod(shape1[a] for a in r)) for r in runs_in)
    r_order = tuple(new_id[tuple(r)] for r in runs)
    return r_shape, r_order


def _pick_tile(dim, budget_elems, align):
    if dim <= budget_elems:
        return dim
    t = max(align, (budget_elems // align) * align)
    return min(dim, t)


def _choose_tiles(r_shape, r_order, itemsize):
    """Per-input-axis tile sizes: lane axes first, then sublane, then free."""
    m = len(r_shape)
    budget = max(1, _MAX_BLOCK_BYTES // itemsize)
    t = [0] * m
    lane_axes = []
    for a in (r_order[-1], m - 1):          # output minor first (store width)
        if a not in lane_axes:
            lane_axes.append(a)
    for a in lane_axes:
        t[a] = _pick_tile(r_shape[a], budget, _LANE)
        budget = max(1, budget // t[a])
    sub_axes = []
    if m >= 2:
        for a in (r_order[-2], m - 2):
            if a not in lane_axes and a not in sub_axes:
                sub_axes.append(a)
    for a in sub_axes:
        t[a] = _pick_tile(r_shape[a], budget, _SUBLANE)
        budget = max(1, budget // t[a])
    # Free axes, innermost output position first: keeps trailing output dims
    # full (enables the lane-dense collapse) and grows leading blocks to
    # amortize per-grid-step overhead for small slabs.
    for j in range(m - 1, -1, -1):
        a = r_order[j]
        if t[a] == 0:
            t[a] = _pick_tile(r_shape[a], budget, 1)
            budget = max(1, budget // t[a])
    return t


def _permute_kernel(r_order, x_ref, o_ref):
    v = jnp.transpose(x_ref[...], r_order)
    o_ref[...] = v.reshape(o_ref.shape)


def _build(r_shape, r_order, dtype, collapse):
    m = len(r_shape)
    itemsize = jnp.dtype(dtype).itemsize
    t = _choose_tiles(r_shape, r_order, itemsize)
    r_out_shape = tuple(r_shape[a] for a in r_order)
    out_tiles = tuple(t[a] for a in r_order)
    inv = [0] * m
    for j, a in enumerate(r_order):
        inv[a] = j
    grid = tuple(pl.cdiv(r_out_shape[j], out_tiles[j]) for j in range(m))

    in_spec = pl.BlockSpec(tuple(t), lambda *g: tuple(g[inv[a]] for a in range(m)))

    pallas_out_shape = r_out_shape
    out_block = out_tiles
    out_map = lambda *g: g
    did_collapse = False
    if collapse and m >= 2 and out_tiles[-1] % _LANE != 0:
        c = 0
        for j in range(m - 1, 0, -1):
            if out_tiles[j] != r_out_shape[j]:
                c = j
                break
        if c <= m - 2:
            tail = int(math.prod(r_out_shape[c + 1:]))
            coll_block = out_tiles[c] * tail
            coll_dim = r_out_shape[c] * tail
            minor_ok = (out_tiles[c] == r_out_shape[c]) or (coll_block % _LANE == 0)
            sub_ok = (c == 0 or out_tiles[c - 1] == r_out_shape[c - 1]
                      or out_tiles[c - 1] % _SUBLANE == 0)
            if minor_ok and sub_ok:
                pallas_out_shape = r_out_shape[:c] + (coll_dim,)
                out_block = out_tiles[:c] + (coll_block,)
                out_map = lambda *g: tuple(g[:c + 1])
                did_collapse = True

    nbytes = int(math.prod(r_shape)) * itemsize
    call = pl.pallas_call(
        partial(_permute_kernel, r_order),
        out_shape=jax.ShapeDtypeStruct(pallas_out_shape, dtype),
        grid=grid,
        in_specs=[in_spec],
        out_specs=pl.BlockSpec(out_block, out_map),
        compiler_params=pltpu.CompilerParams(
            dimension_semantics=("parallel",) * m,
            vmem_limit_bytes=_VMEM_LIMIT_BYTES),
        cost_estimate=pl.CostEstimate(flops=0, transcendentals=0,
                                      bytes_accessed=2 * nbytes),
    )
    return call, did_collapse


_compiled_cache = {}


def permute(x, order):
    """Pallas equivalent of torch's x.permute(*order).contiguous()."""
    order = tuple(int(a) for a in order)
    assert sorted(order) == list(range(x.ndim)), "order must be a permutation"
    out_shape = tuple(x.shape[a] for a in order)

    r_shape, r_order = _simplify(x.shape, order)
    if len(r_shape) <= 1 or r_order == tuple(range(len(r_shape))):
        # Identity-equivalent permutation (only size-1 axes move): metadata only.
        return jnp.reshape(x, out_shape)

    x_r = jnp.reshape(x, r_shape)  # contiguous collapse of adjacent dims; free

    key = (r_shape, r_order, str(jnp.dtype(x.dtype)))
    call = _compiled_cache.get(key)
    if call is None:
        call, did = _build(r_shape, r_order, x.dtype, collapse=True)
        if did:
            # Called eagerly (not under an outer jit) so a Mosaic lowering
            # failure of the lane-dense store path can be caught and we can
            # fall back to the direct store path.
            try:
                y = call(x_r)
                _compiled_cache[key] = call
                return jnp.reshape(y, out_shape)
            except Exception:
                call, _ = _build(r_shape, r_order, x.dtype, collapse=False)
        _compiled_cache[key] = call
    y = call(x_r)
    return jnp.reshape(y, out_shape)


if __name__ == "__main__":
    key = jax.random.PRNGKey(0)
    # Small NCHW feature map, as a PyTorch conv output would be.
    x = jax.random.normal(key, (2, 4, 16, 16), dtype=jnp.float32)

    cases = [
        (0, 2, 3, 1),   # NCHW -> NHWC (typical Permute usage)
        (2, 0, 3, 1),   # leading axis moves (general case)
        (1, 0, 2, 3),   # swap batch/channel (trailing axes untouched)
        (0, 1, 2, 3),   # identity
    ]
    for order in cases:
        out = jax.block_until_ready(permute(x, order))
        ref = jnp.transpose(x, order)
        assert out.shape == ref.shape, (order, out.shape, ref.shape)
        assert out.dtype == ref.dtype
        assert jnp.array_equal(out, ref), f"Pallas permute mismatch for order={order}"

    print("KERNEL_OK")
</pallas_src>

<mosaic_0001>
module attributes {stable_mosaic.version = 11 : i64} {
  func.func @_permute_kernel(%arg0: i32, %arg1: i32, %arg2: i32, %arg3: memref<2x4x256xf32, #tpu.memory_space<vmem>>, %arg4: memref<2x256x4xf32, #tpu.memory_space<vmem>>) attributes {dimension_semantics = [#tpu.dimension_semantics<parallel>, #tpu.dimension_semantics<parallel>, #tpu.dimension_semantics<parallel>], iteration_bounds = array<i64: 1, 1, 1>, scalar_prefetch = 0 : i64, scratch_operands = 0 : i64, tpu.core_type = #tpu.core_type<tc>, window_params = [{transform_indices = @transform_0, window_bounds = array<i64: 2, 4, 256>}, {transform_indices = @transform_1, window_bounds = array<i64: 2, 256, 4>}]} {
    %c0 = arith.constant 0 : index
    %c0_0 = arith.constant 0 : index
    %c0_1 = arith.constant 0 : index
    %0 = vector.load %arg3[%c0, %c0_0, %c0_1] : memref<2x4x256xf32, #tpu.memory_space<vmem>>, vector<2x4x256xf32>
    %1 = tpu.transpose %0, [0, 2, 1] : vector<2x4x256xf32> -> vector<2x256x4xf32>
    %c0_2 = arith.constant 0 : index
    %c0_3 = arith.constant 0 : index
    %c0_4 = arith.constant 0 : index
    %2 = vector.load %arg4[%c0_2, %c0_3, %c0_4] : memref<2x256x4xf32, #tpu.memory_space<vmem>>, vector<2x256x4xf32>
    tpu.vector_store %arg4[%c0_2, %c0_3, %c0_4], %1 {strides = array<i32>} : memref<2x256x4xf32, #tpu.memory_space<vmem>>, vector<2x256x4xf32>,
    return
  }
  func.func @transform_0(%arg0: i32, %arg1: i32, %arg2: i32) -> (i32, i32, i32) {
    %c0_i32 = arith.constant 0 : i32
    return %arg0, %arg2, %arg1 : i32, i32, i32
  }
  func.func @transform_1(%arg0: i32, %arg1: i32, %arg2: i32) -> (i32, i32, i32) {
    %c0_i32 = arith.constant 0 : i32
    return %arg0, %arg1, %arg2 : i32, i32, i32
  }
}

</mosaic_0001>

<bundles_post_ra>
// kernel: tpu_custom_call.1
= control target key start
LH: loop header
LB: loop body
LE: loop exit
PB: predicated region body
PF: predicated region fallthrough
CT: control target
= control target key end

     0   :  { %6 = vsyncpa [#allocation3], 0  ;;  %s258_s6 = smov [#allocation2]   ;;  %s539_s0 = inlined_call_operand.hbm [shape: f32[2,4,256], index: 0, kind: input, shape index: {}]   ;;  %s540_s1 = inlined_call_operand.vmem [shape: f32[2,256,4], index: 1, kind: output, shape index: {}]  }
   0x1   :  { %s12_s7 = sshll.u32 %s258_s6, 4  ;;  %s234_s10 = scalar_lea.hbm %s539_s0, 256  ;;  %s13_s7 = int_to_ptr.vmem [resolvable:$true] %s12_s7 }
   0x2   :  { %p235_p0 = scmp.ne.s32.totalorder %s539_s0, %s234_s10  ;;  %p238_p1 = scmp.lt.u32.totalorder %s234_s10, %s539_s0 }
   0x4   :  { %p240_p2 = pnand %p238_p1, %p235_p0 }
   0x6   :  { %243 = shalt.err (!%p240_p2)
}
   0x7   :  { %s244_s15 = scalar_lea.vmem %s13_s7, 256  ;;  %p249_p4 = scmp.lt.s32.totalorder %s13_s7, %s13_s7 }
   0x8   :  { %p245_p3 = scmp.ne.s32.totalorder %s13_s7, %s244_s15  ;;  %p250_p5 = scmp.lt.s32.totalorder %s244_s15, %s244_s15 }
   0xa   :  { %p251_p6 = por %p250_p5, %p249_p4 }
   0xc   :  { %p252_p7 = pnand %p251_p6, %p245_p3 }
   0xe   :  { %255 = shalt.err (!%p252_p7)
}
   0xf   :  { %s259_s16 = smov 128   ;;  %s260_s17 = smov 8  }
  0x10   :  { %18 = dma.hbm_to_vmem [thread:$0]  %s539_s0, 256, %s13_s7, [#allocation3], %s259_s16, %s259_s16, %s260_s17  }
  0x11   :  { %256 = dma.done.wait [#allocation3], 256  }
  0x12   :  { %257 = vsyncadd [#allocation3], 4294967040  ;;  %v23_v0 = vld [vmem:[#allocation2 + $0x8] sm:$0xff]  ;;  %v22_v1 = vld [vmem:[#allocation2] sm:$0xff]  ;;  %vm158_vm0 = vcmask 31744  }
  0x13   :  { %94 = vxpose.xlu1.b32.start.end [1/1] (short) %v23_v0, 128  ;;  %30 = vxpose.xlu0.b32.start.end [1/1] (short) %v22_v1, 128  ;;  %v27_v2 = vcombine.high %v23_v0, %v23_v0  ;;  %v26_v3 = vcombine.high %v22_v1, %v22_v1 }
  0x50   :  { %126 = vxpose.xlu1.b32.start.end [1/1] (short) %v27_v2, 128  ;;  %62 = vxpose.xlu0.b32.start.end [1/1] (short) %v26_v3, 128 }
  0x93   :  { %v110_v4 = vpop.trf.xlu1  ;;  %v46_v5 = vpop.trf.xlu0 }
  0x94   :  { %191 = vst.msk [vmem:[%s540_s1 + $0x100] sm:$0xff] %vm158_vm0, %v110_v4  ;;  %159 = vst.msk [vmem:[%s540_s1] sm:$0xff] %vm158_vm0, %v46_v5 }
  0x97   :  { %v111_v6 = vpop.trf.xlu1  ;;  %v47_v7 = vpop.trf.xlu0 }
  0x98   :  { %192 = vst.msk [vmem:[%s540_s1 + $0x108] sm:$0xff] %vm158_vm0, %v111_v6  ;;  %160 = vst.msk [vmem:[%s540_s1 + $0x8] sm:$0xff] %vm158_vm0, %v47_v7 }
  0x9b   :  { %v112_v8 = vpop.trf.xlu1  ;;  %v48_v9 = vpop.trf.xlu0 }
  0x9c   :  { %193 = vst.msk [vmem:[%s540_s1 + $0x110] sm:$0xff] %vm158_vm0, %v112_v8  ;;  %161 = vst.msk [vmem:[%s540_s1 + $0x10] sm:$0xff] %vm158_vm0, %v48_v9 }
  0x9f   :  { %v113_v10 = vpop.trf.xlu1  ;;  %v49_v11 = vpop.trf.xlu0 }
  0xa0   :  { %194 = vst.msk [vmem:[%s540_s1 + $0x118] sm:$0xff] %vm158_vm0, %v113_v10  ;;  %162 = vst.msk [vmem:[%s540_s1 + $0x18] sm:$0xff] %vm158_vm0, %v49_v11 }
  0xa3   :  { %v114_v12 = vpop.trf.xlu1  ;;  %v50_v13 = vpop.trf.xlu0 }
  0xa4   :  { %195 = vst.msk [vmem:[%s540_s1 + $0x120] sm:$0xff] %vm158_vm0, %v114_v12  ;;  %163 = vst.msk [vmem:[%s540_s1 + $0x20] sm:$0xff] %vm158_vm0, %v50_v13 }
  0xa7   :  { %v115_v14 = vpop.trf.xlu1  ;;  %v51_v15 = vpop.trf.xlu0 }
  0xa8   :  { %196 = vst.msk [vmem:[%s540_s1 + $0x128] sm:$0xff] %vm158_vm0, %v115_v14  ;;  %164 = vst.msk [vmem:[%s540_s1 + $0x28] sm:$0xff] %vm158_vm0, %v51_v15 }
  0xab   :  { %v116_v16 = vpop.trf.xlu1  ;;  %v52_v17 = vpop.trf.xlu0 }
  0xac   :  { %197 = vst.msk [vmem:[%s540_s1 + $0x130] sm:$0xff] %vm158_vm0, %v116_v16  ;;  %165 = vst.msk [vmem:[%s540_s1 + $0x30] sm:$0xff] %vm158_vm0, %v52_v17 }
  0xaf   :  { %v117_v18 = vpop.trf.xlu1  ;;  %v53_v19 = vpop.trf.xlu0 }
  0xb0   :  { %198 = vst.msk [vmem:[%s540_s1 + $0x138] sm:$0xff] %vm158_vm0, %v117_v18  ;;  %166 = vst.msk [vmem:[%s540_s1 + $0x38] sm:$0xff] %vm158_vm0, %v53_v19 }
  0xb3   :  { %v118_v20 = vpop.trf.xlu1  ;;  %v54_v21 = vpop.trf.xlu0 }
  0xb4   :  { %199 = vst.msk [vmem:[%s540_s1 + $0x140] sm:$0xff] %vm158_vm0, %v118_v20  ;;  %167 = vst.msk [vmem:[%s540_s1 + $0x40] sm:$0xff] %vm158_vm0, %v54_v21 }
  0xb7   :  { %v119_v22 = vpop.trf.xlu1  ;;  %v55_v23 = vpop.trf.xlu0 }
  0xb8   :  { %200 = vst.msk [vmem:[%s540_s1 + $0x148] sm:$0xff] %vm158_vm0, %v119_v22  ;;  %168 = vst.msk [vmem:[%s540_s1 + $0x48] sm:$0xff] %vm158_vm0, %v55_v23 }
  0xbb   :  { %v120_v24 = vpop.trf.xlu1  ;;  %v56_v25 = vpop.trf.xlu0 }
  0xbc   :  { %201 = vst.msk [vmem:[%s540_s1 + $0x150] sm:$0xff] %vm158_vm0, %v120_v24  ;;  %169 = vst.msk [vmem:[%s540_s1 + $0x50] sm:$0xff] %vm158_vm0, %v56_v25 }
  0xbf   :  { %v121_v26 = vpop.trf.xlu1  ;;  %v57_v27 = vpop.trf.xlu0 }
  0xc0   :  { %202 = vst.msk [vmem:[%s540_s1 + $0x158] sm:$0xff] %vm158_vm0, %v121_v26  ;;  %170 = vst.msk [vmem:[%s540_s1 + $0x58] sm:$0xff] %vm158_vm0, %v57_v27 }
  0xc3   :  { %v122_v28 = vpop.trf.xlu1  ;;  %v58_v29 = vpop.trf.xlu0 }
  0xc4   :  { %203 = vst.msk [vmem:[%s540_s1 + $0x160] sm:$0xff] %vm158_vm0, %v122_v28  ;;  %171 = vst.msk [vmem:[%s540_s1 + $0x60] sm:$0xff] %vm158_vm0, %v58_v29 }
  0xc7   :  { %v123_v30 = vpop.trf.xlu1  ;;  %v59_v31 = vpop.trf.xlu0 }
  0xc8   :  { %204 = vst.msk [vmem:[%s540_s1 + $0x168] sm:$0xff] %vm158_vm0, %v123_v30  ;;  %172 = vst.msk [vmem:[%s540_s1 + $0x68] sm:$0xff] %vm158_vm0, %v59_v31 }
  0xcb   :  { %v124_v32 = vpop.trf.xlu1  ;;  %v60_v33 = vpop.trf.xlu0 }
  0xcc   :  { %205 = vst.msk [vmem:[%s540_s1 + $0x170] sm:$0xff] %vm158_vm0, %v124_v32  ;;  %173 = vst.msk [vmem:[%s540_s1 + $0x70] sm:$0xff] %vm158_vm0, %v60_v33 }
  0xcf   :  { %v125_v34 = vpop.trf.xlu1  ;;  %v61_v35 = vpop.trf.xlu0 }
  0xd0   :  { %206 = vst.msk [vmem:[%s540_s1 + $0x178] sm:$0xff] %vm158_vm0, %v125_v34  ;;  %174 = vst.msk [vmem:[%s540_s1 + $0x78] sm:$0xff] %vm158_vm0, %v61_v35 }
  0xd3   :  { %v142_v36 = vpop.trf.xlu1  ;;  %v78_v37 = vpop.trf.xlu0 }
  0xd4   :  { %207 = vst.msk [vmem:[%s540_s1 + $0x180] sm:$0xff] %vm158_vm0, %v142_v36  ;;  %175 = vst.msk [vmem:[%s540_s1 + $0x80] sm:$0xff] %vm158_vm0, %v78_v37 }
  0xd7   :  { %v143_v38 = vpop.trf.xlu1  ;;  %v79_v39 = vpop.trf.xlu0 }
  0xd8   :  { %208 = vst.msk [vmem:[%s540_s1 + $0x188] sm:$0xff] %vm158_vm0, %v143_v38  ;;  %176 = vst.msk [vmem:[%s540_s1 + $0x88] sm:$0xff] %vm158_vm0, %v79_v39 }
  0xdb   :  { %v144_v40 = vpop.trf.xlu1  ;;  %v80_v41 = vpop.trf.xlu0 }
  0xdc   :  { %209 = vst.msk [vmem:[%s540_s1 + $0x190] sm:$0xff] %vm158_vm0, %v144_v40  ;;  %177 = vst.msk [vmem:[%s540_s1 + $0x90] sm:$0xff] %vm158_vm0, %v80_v41 }
  0xdf   :  { %v145_v42 = vpop.trf.xlu1  ;;  %v81_v43 = vpop.trf.xlu0 }
  0xe0   :  { %210 = vst.msk [vmem:[%s540_s1 + $0x198] sm:$0xff] %vm158_vm0, %v145_v42  ;;  %178 = vst.msk [vmem:[%s540_s1 + $0x98] sm:$0xff] %vm158_vm0, %v81_v43 }
  0xe3   :  { %v146_v44 = vpop.trf.xlu1  ;;  %v82_v45 = vpop.trf.xlu0 }
  0xe4   :  { %211 = vst.msk [vmem:[%s540_s1 + $0x1a0] sm:$0xff] %vm158_vm0, %v146_v44  ;;  %179 = vst.msk [vmem:[%s540_s1 + $0xa0] sm:$0xff] %vm158_vm0, %v82_v45 }
  0xe7   :  { %v147_v46 = vpop.trf.xlu1  ;;  %v83_v47 = vpop.trf.xlu0 }
  0xe8   :  { %212 = vst.msk [vmem:[%s540_s1 + $0x1a8] sm:$0xff] %vm158_vm0, %v147_v46  ;;  %180 = vst.msk [vmem:[%s540_s1 + $0xa8] sm:$0xff] %vm158_vm0, %v83_v47 }
  0xeb   :  { %v148_v48 = vpop.trf.xlu1  ;;  %v84_v49 = vpop.trf.xlu0 }
  0xec   :  { %213 = vst.msk [vmem:[%s540_s1 + $0x1b0] sm:$0xff] %vm158_vm0, %v148_v48  ;;  %181 = vst.msk [vmem:[%s540_s1 + $0xb0] sm:$0xff] %vm158_vm0, %v84_v49 }
  0xef   :  { %v149_v50 = vpop.trf.xlu1  ;;  %v85_v51 = vpop.trf.xlu0 }
  0xf0   :  { %214 = vst.msk [vmem:[%s540_s1 + $0x1b8] sm:$0xff] %vm158_vm0, %v149_v50  ;;  %182 = vst.msk [vmem:[%s540_s1 + $0xb8] sm:$0xff] %vm158_vm0, %v85_v51 }
  0xf3   :  { %v150_v52 = vpop.trf.xlu1  ;;  %v86_v53 = vpop.trf.xlu0 }
  0xf4   :  { %215 = vst.msk [vmem:[%s540_s1 + $0x1c0] sm:$0xff] %vm158_vm0, %v150_v52  ;;  %183 = vst.msk [vmem:[%s540_s1 + $0xc0] sm:$0xff] %vm158_vm0, %v86_v53 }
  0xf7   :  { %v151_v54 = vpop.trf.xlu1  ;;  %v87_v55 = vpop.trf.xlu0 }
  0xf8   :  { %216 = vst.msk [vmem:[%s540_s1 + $0x1c8] sm:$0xff] %vm158_vm0, %v151_v54  ;;  %184 = vst.msk [vmem:[%s540_s1 + $0xc8] sm:$0xff] %vm158_vm0, %v87_v55 }
  0xfb   :  { %v152_v56 = vpop.trf.xlu1  ;;  %v88_v57 = vpop.trf.xlu0 }
  0xfc   :  { %217 = vst.msk [vmem:[%s540_s1 + $0x1d0] sm:$0xff] %vm158_vm0, %v152_v56  ;;  %185 = vst.msk [vmem:[%s540_s1 + $0xd0] sm:$0xff] %vm158_vm0, %v88_v57 }
  0xff   :  { %v153_v58 = vpop.trf.xlu1  ;;  %v89_v59 = vpop.trf.xlu0 }
 0x100   :  { %218 = vst.msk [vmem:[%s540_s1 + $0x1d8] sm:$0xff] %vm158_vm0, %v153_v58  ;;  %186 = vst.msk [vmem:[%s540_s1 + $0xd8] sm:$0xff] %vm158_vm0, %v89_v59 }
 0x103   :  { %v154_v60 = vpop.trf.xlu1  ;;  %v90_v61 = vpop.trf.xlu0 }
 0x104   :  { %219 = vst.msk [vmem:[%s540_s1 + $0x1e0] sm:$0xff] %vm158_vm0, %v154_v60  ;;  %187 = vst.msk [vmem:[%s540_s1 + $0xe0] sm:$0xff] %vm158_vm0, %v90_v61 }
 0x107   :  { %v155_v62 = vpop.trf.xlu1  ;;  %v91_v63 = vpop.trf.xlu0 }
 0x108   :  { %220 = vst.msk [vmem:[%s540_s1 + $0x1e8] sm:$0xff] %vm158_vm0, %v155_v62  ;;  %188 = vst.msk [vmem:[%s540_s1 + $0xe8] sm:$0xff] %vm158_vm0, %v91_v63 }
 0x10b   :  { %v156_v0 = vpop.trf.xlu1  ;;  %v92_v1 = vpop.trf.xlu0 }
 0x10c   :  { %221 = vst.msk [vmem:[%s540_s1 + $0x1f0] sm:$0xff] %vm158_vm0, %v156_v0  ;;  %189 = vst.msk [vmem:[%s540_s1 + $0xf0] sm:$0xff] %vm158_vm0, %v92_v1 }
 0x10f   :  { %v157_v2 = vpop.trf.xlu1  ;;  %v93_v3 = vpop.trf.xlu0 }
 0x110   :  { %222 = vst.msk [vmem:[%s540_s1 + $0x1f8] sm:$0xff] %vm158_vm0, %v157_v2  ;;  %190 = vst.msk [vmem:[%s540_s1 + $0xf8] sm:$0xff] %vm158_vm0, %v93_v3 }
 0x111   :  { %227 = vsyncpa [#allocation3], 1 }

</bundles_post_ra>
